<compile_context>
chip_gen: v6e
topology: v6e:2x2x1
jax: 0.10.0
libtpu: 0.0.40
codegen_flags: <defaults>
</compile_context>

<pallas_src>
import math
from functools import partial

import jax
import jax.numpy as jnp
from jax.experimental import pallas as pl
from jax.experimental.pallas import tpu as pltpu


def _merger_kernel(ens_ref, wt_ref, bias_ref, qmat_ref, expand_ref, out_ref,
                   *, C, E, H, N, TB, eps, log_std):
    # ens_ref   : (TB, N, C)  bf16  TB batch elements per grid step
    # wt_ref    : (C, C+E)    bf16  Conv1d weight, pre-transposed
    # bias_ref  : (1, C+E)    f32   Conv1d bias
    # qmat_ref  : (E, H)      f32   block-diag packed per-head query, pre-scaled 1/sqrt(d)
    # expand_ref: (H, C)      f32   one-hot head -> channel expansion
    # out_ref   : (TB, 2C)    f32   [mu (C) | sigma (C)] per batch element
    x = ens_ref[...].reshape(TB * N, C)                      # flatten batch into matmul M
    y = jnp.dot(x, wt_ref[...],
                preferred_element_type=jnp.float32)          # (TB*N, C+E) on MXU
    y = y + bias_ref[...]

    values = y[:, :C].reshape(TB, N, C)                      # (TB, N, C)
    keys = y[:, C:]                                          # (TB*N, E)

    # Per-head attention scores over the ensemble axis (1/sqrt(d) folded into qmat).
    scores = jnp.dot(keys, qmat_ref[...],
                     preferred_element_type=jnp.float32).reshape(TB, N, H)
    scores = scores - jnp.max(scores, axis=1, keepdims=True)
    w = jnp.exp(scores)
    inv = pl.reciprocal(jnp.sum(w, axis=1, keepdims=True), approx=True)
    attn = w * inv                                           # (TB, N, H) softmax over N

    # Expand per-head attention to per-channel via a tiny one-hot matmul (MXU slot).
    attn_c = jnp.dot(attn.reshape(TB * N, H), expand_ref[...],
                     preferred_element_type=jnp.float32).reshape(TB, N, C)

    mu = jnp.sum(attn_c * values, axis=1)                    # (TB, C)
    diff = values - mu[:, None, :]
    var = jnp.sum(attn_c * diff * diff, axis=1)              # (TB, C)
    sigma = jnp.sqrt(var)
    if eps > 0:
        sigma = sigma + eps
    if log_std:
        sigma = jnp.log(sigma)

    # Direct slice stores (no concatenate, TB rows per store).
    out_ref[:, :C] = mu
    out_ref[:, C:] = sigma


def weighted_mean_std_merger(ensemble, conv_w, conv_b, query, *,
                             num_heads=1, eps=0.0, log_std=False,
                             keepdim=False, block_b=128):
    """ensemble: (B, N, C). conv_w: (C+E, C). conv_b: (C+E,). query: (H, E//H).
    Returns (B, 2C), or (B, 1, 2C) if keepdim (unsqueeze at dim=-2)."""
    B, N, C = ensemble.shape
    CE = conv_w.shape[0]
    E = CE - C
    H = num_heads
    d = E // H

    # Batch tiling: TB batch elements per grid step (pad B to a multiple of TB).
    # TODO(synk): on v7x halve block_b if tiles are sized near the 32 MiB scoped VMEM limit.
    TB = B if B <= block_b else block_b
    B_pad = pl.cdiv(B, TB) * TB
    num_blocks = B_pad // TB

    ens = jnp.asarray(ensemble, jnp.float32)
    if B_pad != B:
        ens = jnp.pad(ens, ((0, B_pad - B), (0, 0), (0, 0)))
    ens_bf16 = ens.astype(jnp.bfloat16)                          # halve HBM traffic
    wt_bf16 = jnp.asarray(conv_w, jnp.float32).T.astype(jnp.bfloat16)   # (C, C+E)
    bias2d = jnp.asarray(conv_b, jnp.float32).reshape(1, CE)

    # Block-diagonal packing of the per-head query, with 1/sqrt(d) folded in: (E, H).
    qmat = jnp.zeros((E, H), dtype=jnp.float32)
    for h in range(H):
        qmat = qmat.at[h * d:(h + 1) * d, h].set(
            jnp.asarray(query[h], jnp.float32))
    qmat = qmat / math.sqrt(d)

    # One-hot head -> channel expansion: expand[h, c] = 1 iff c // (C // H) == h.
    expand = jnp.repeat(jnp.eye(H, dtype=jnp.float32), C // H, axis=1)  # (H, C)

    kernel = partial(_merger_kernel, C=C, E=E, H=H, N=N, TB=TB,
                     eps=float(eps), log_std=bool(log_std))

    out = pl.pallas_call(
        kernel,
        out_shape=jax.ShapeDtypeStruct((B_pad, 2 * C), jnp.float32),
        grid_spec=pltpu.PrefetchScalarGridSpec(
            num_scalar_prefetch=0,
            grid=(num_blocks,),
            in_specs=[
                pl.BlockSpec((TB, N, C), lambda b: (b, 0, 0)),   # streamed ensemble tile
                pl.BlockSpec((C, CE), lambda b: (0, 0)),         # resident weight
                pl.BlockSpec((1, CE), lambda b: (0, 0)),         # resident bias
                pl.BlockSpec((E, H), lambda b: (0, 0)),          # resident query
                pl.BlockSpec((H, C), lambda b: (0, 0)),          # resident expansion
            ],
            out_specs=pl.BlockSpec((TB, 2 * C), lambda b: (b, 0)),
        ),
        compiler_params=pltpu.CompilerParams(
            dimension_semantics=("parallel",)),
    )(ens_bf16, wt_bf16, bias2d, qmat, expand)

    out = out[:B]
    if keepdim:
        out = out[:, None, :]     # unsqueeze at dim=-2
    return out


def _reference(ensemble, conv_w, conv_b, query, *, num_heads=1,
               eps=0.0, log_std=False, keepdim=False):
    """Pure-JAX mirror of the PyTorch forward (for validation)."""
    B, N, C = ensemble.shape
    CE = conv_w.shape[0]
    E = CE - C
    H = num_heads
    d = E // H
    x = jnp.swapaxes(ensemble, -1, -2)                          # (B, C, N)
    y = jnp.einsum('oc,bcn->bon', conv_w, x) + conv_b[None, :, None]
    values, keys = y[:, :C, :], y[:, C:, :]
    keys = keys.reshape(B, H, d, N)
    values = values.reshape(B, H, C // H, N)
    scores = jnp.einsum('hd,bhdn->bhn', query, keys) / math.sqrt(d)
    attn = jax.nn.softmax(scores, axis=-1)[:, :, None, :]       # (B, H, 1, N)
    mu = jnp.sum(attn * values, axis=-1, keepdims=True)
    sigma = jnp.sqrt(jnp.sum(attn * (values - mu) ** 2, axis=-1, keepdims=True))
    if eps > 0:
        sigma = sigma + eps
    if log_std:
        sigma = jnp.log(sigma)
    out = jnp.concatenate([mu, sigma], axis=-3).reshape(B, -1)  # (B, 2C)
    if keepdim:
        out = out[:, None, :]
    return out


def _run_case(*, B, N, C, E, H, eps, log_std, keepdim, block_b, key):
    k1, k2, k3, k4 = jax.random.split(key, 4)
    ensemble = jax.random.normal(k1, (B, N, C), dtype=jnp.float32)

    bound = 1.0 / math.sqrt(C)
    conv_w = jax.random.uniform(k2, (C + E, C), minval=-bound, maxval=bound,
                                dtype=jnp.float32)
    conv_b = jax.random.uniform(k3, (C + E,), minval=-bound, maxval=bound,
                                dtype=jnp.float32)
    d = E // H
    query = (jax.random.uniform(k4, (H, d), dtype=jnp.float32) - 0.5) / 10.0

    out = weighted_mean_std_merger(ensemble, conv_w, conv_b, query,
                                   num_heads=H, eps=eps, log_std=log_std,
                                   keepdim=keepdim, block_b=block_b)
    out = jax.block_until_ready(out)

    # Reference sees the same bf16 rounding the kernel applies to streamed inputs.
    ens_r = ensemble.astype(jnp.bfloat16).astype(jnp.float32)
    w_r = conv_w.astype(jnp.bfloat16).astype(jnp.float32)
    ref = _reference(ens_r, w_r, conv_b, query, num_heads=H, eps=eps,
                     log_std=log_std, keepdim=keepdim)

    expected_shape = (B, 1, 2 * C) if keepdim else (B, 2 * C)
    assert out.shape == expected_shape, (out.shape, expected_shape)
    max_err = float(jnp.max(jnp.abs(out - ref)))
    assert jnp.allclose(out, ref, atol=5e-3, rtol=5e-3), max_err


if __name__ == "__main__":
    key = jax.random.PRNGKey(0)
    k_a, k_b = jax.random.split(key)

    # Single-head, single grid step (TB == B).
    _run_case(B=2, N=8, C=32, E=32, H=1, eps=0.0, log_std=False,
              keepdim=False, block_b=128, key=k_a)

    # Multi-head, multi-step grid with batch padding, keepdim + eps + log_std.
    _run_case(B=20, N=8, C=32, E=64, H=4, eps=1e-3, log_std=True,
              keepdim=True, block_b=8, key=k_b)

    print("KERNEL_OK")
</pallas_src>

<mosaic_0001>
module attributes {stable_mosaic.version = 11 : i64} {
  func.func @_merger_kernel(%arg0: i32, %arg1: memref<2x8x32xbf16, #tpu.memory_space<vmem>>, %arg2: memref<32x64xbf16, #tpu.memory_space<vmem>>, %arg3: memref<1x64xf32, #tpu.memory_space<vmem>>, %arg4: memref<32x1xf32, #tpu.memory_space<vmem>>, %arg5: memref<1x32xf32, #tpu.memory_space<vmem>>, %arg6: memref<2x64xf32, #tpu.memory_space<vmem>>) attributes {dimension_semantics = [#tpu.dimension_semantics<parallel>], iteration_bounds = array<i64: 1>, scalar_prefetch = 0 : i64, scratch_operands = 0 : i64, tpu.core_type = #tpu.core_type<tc>, window_params = [{transform_indices = @transform_0, window_bounds = array<i64: 2, 8, 32>}, {pipeline_mode = #tpu.pipeline_mode<synchronous>, transform_indices = @transform_1, window_bounds = array<i64: 32, 64>}, {pipeline_mode = #tpu.pipeline_mode<synchronous>, transform_indices = @transform_2, window_bounds = array<i64: 1, 64>}, {pipeline_mode = #tpu.pipeline_mode<synchronous>, transform_indices = @transform_3, window_bounds = array<i64: 32, 1>}, {pipeline_mode = #tpu.pipeline_mode<synchronous>, transform_indices = @transform_4, window_bounds = array<i64: 1, 32>}, {transform_indices = @transform_5, window_bounds = array<i64: 2, 64>}]} {
    %c0 = arith.constant 0 : index
    %c0_0 = arith.constant 0 : index
    %c0_1 = arith.constant 0 : index
    %0 = vector.load %arg1[%c0, %c0_0, %c0_1] : memref<2x8x32xbf16, #tpu.memory_space<vmem>>, vector<2x8x32xbf16>
    %1 = vector.shape_cast %0 : vector<2x8x32xbf16> to vector<16x32xbf16>
    %c0_2 = arith.constant 0 : index
    %c0_3 = arith.constant 0 : index
    %2 = vector.load %arg2[%c0_2, %c0_3] : memref<32x64xbf16, #tpu.memory_space<vmem>>, vector<32x64xbf16>
    %cst = arith.constant dense<0.000000e+00> : vector<16x64xf32>
    %3 = tpu.matmul %1, %2, %cst {dimension_numbers = #tpu.dot_dimension_numbers<[1], [0], [0], [1], [0, 0, 1, 1], [], []>} : vector<16x32xbf16>, vector<32x64xbf16>, vector<16x64xf32> -> vector<16x64xf32>
    %c0_4 = arith.constant 0 : index
    %c0_5 = arith.constant 0 : index
    %4 = vector.load %arg3[%c0_4, %c0_5] : memref<1x64xf32, #tpu.memory_space<vmem>>, vector<1x64xf32>
    %5 = vector.broadcast %4 : vector<1x64xf32> to vector<16x64xf32>
    %6 = arith.addf %3, %5 : vector<16x64xf32>
    %7 = vector.extract_strided_slice %6 {offsets = [0, 0], sizes = [16, 32], strides = [1, 1]} : vector<16x64xf32> to vector<16x32xf32>
    %8 = vector.shape_cast %7 : vector<16x32xf32> to vector<2x8x32xf32>
    %9 = vector.extract_strided_slice %6 {offsets = [0, 32], sizes = [16, 32], strides = [1, 1]} : vector<16x64xf32> to vector<16x32xf32>
    %c0_6 = arith.constant 0 : index
    %c0_7 = arith.constant 0 : index
    %10 = vector.load %arg4[%c0_6, %c0_7] : memref<32x1xf32, #tpu.memory_space<vmem>>, vector<32x1xf32>
    %cst_8 = arith.constant dense<0.000000e+00> : vector<16x1xf32>
    %11 = tpu.matmul %9, %10, %cst_8 {dimension_numbers = #tpu.dot_dimension_numbers<[1], [0], [0], [1], [0, 0, 1, 1], [], []>} : vector<16x32xf32>, vector<32x1xf32>, vector<16x1xf32> -> vector<16x1xf32>
    %12 = vector.shape_cast %11 : vector<16x1xf32> to vector<2x8x1xf32>
    %cst_9 = arith.constant dense<0xFF800000> : vector<2x1xf32>
    %13 = vector.multi_reduction <maximumf>, %12, %cst_9 [1] : vector<2x8x1xf32> to vector<2x1xf32>
    %14 = vector.shape_cast %13 : vector<2x1xf32> to vector<2x1x1xf32>
    %15 = vector.broadcast %14 : vector<2x1x1xf32> to vector<2x8x1xf32>
    %16 = arith.subf %12, %15 : vector<2x8x1xf32>
    %17 = math.exp %16 : vector<2x8x1xf32>
    %cst_10 = arith.constant dense<0.000000e+00> : vector<2x1xf32>
    %18 = vector.multi_reduction <add>, %17, %cst_10 [1] : vector<2x8x1xf32> to vector<2x1xf32>
    %19 = vector.shape_cast %18 : vector<2x1xf32> to vector<2x1x1xf32>
    %20 = tpu.reciprocal %19 {approx = true} : vector<2x1x1xf32> -> vector<2x1x1xf32>
    %21 = vector.broadcast %20 : vector<2x1x1xf32> to vector<2x8x1xf32>
    %22 = arith.mulf %17, %21 : vector<2x8x1xf32>
    %23 = vector.shape_cast %22 : vector<2x8x1xf32> to vector<16x1xf32>
    %c0_11 = arith.constant 0 : index
    %c0_12 = arith.constant 0 : index
    %24 = vector.load %arg5[%c0_11, %c0_12] : memref<1x32xf32, #tpu.memory_space<vmem>>, vector<1x32xf32>
    %cst_13 = arith.constant dense<0.000000e+00> : vector<16x32xf32>
    %25 = tpu.matmul %23, %24, %cst_13 {dimension_numbers = #tpu.dot_dimension_numbers<[1], [0], [0], [1], [0, 0, 1, 1], [], []>} : vector<16x1xf32>, vector<1x32xf32>, vector<16x32xf32> -> vector<16x32xf32>
    %26 = vector.shape_cast %25 : vector<16x32xf32> to vector<2x8x32xf32>
    %27 = arith.mulf %26, %8 : vector<2x8x32xf32>
    %cst_14 = arith.constant dense<0.000000e+00> : vector<2x32xf32>
    %28 = vector.multi_reduction <add>, %27, %cst_14 [1] : vector<2x8x32xf32> to vector<2x32xf32>
    %29 = vector.shape_cast %28 : vector<2x32xf32> to vector<2x1x32xf32>
    %30 = vector.broadcast %29 : vector<2x1x32xf32> to vector<2x8x32xf32>
    %31 = arith.subf %8, %30 : vector<2x8x32xf32>
    %32 = arith.mulf %26, %31 : vector<2x8x32xf32>
    %33 = arith.mulf %32, %31 : vector<2x8x32xf32>
    %cst_15 = arith.constant dense<0.000000e+00> : vector<2x32xf32>
    %34 = vector.multi_reduction <add>, %33, %cst_15 [1] : vector<2x8x32xf32> to vector<2x32xf32>
    %35 = math.sqrt %34 : vector<2x32xf32>
    %c0_16 = arith.constant 0 : index
    %c0_17 = arith.constant 0 : index
    %36 = vector.load %arg6[%c0_16, %c0_17] : memref<2x64xf32, #tpu.memory_space<vmem>>, vector<2x32xf32>
    tpu.vector_store %arg6[%c0_16, %c0_17], %28 {strides = array<i32>} : memref<2x64xf32, #tpu.memory_space<vmem>>, vector<2x32xf32>,
    %c0_18 = arith.constant 0 : index
    %c32 = arith.constant 32 : index
    %37 = vector.load %arg6[%c0_18, %c32] : memref<2x64xf32, #tpu.memory_space<vmem>>, vector<2x32xf32>
    tpu.vector_store %arg6[%c0_18, %c32], %35 {strides = array<i32>} : memref<2x64xf32, #tpu.memory_space<vmem>>, vector<2x32xf32>,
    return
  }
  func.func @transform_0(%arg0: i32) -> (i32, i32, i32) {
    %c0_i32 = arith.constant 0 : i32
    %c0_i32_0 = arith.constant 0 : i32
    %c0_i32_1 = arith.constant 0 : i32
    return %arg0, %c0_i32, %c0_i32_0 : i32, i32, i32
  }
  func.func @transform_1(%arg0: i32) -> (i32, i32) {
    %c0_i32 = arith.constant 0 : i32
    %c0_i32_0 = arith.constant 0 : i32
    %c0_i32_1 = arith.constant 0 : i32
    return %c0_i32, %c0_i32_0 : i32, i32
  }
  func.func @transform_2(%arg0: i32) -> (i32, i32) {
    %c0_i32 = arith.constant 0 : i32
    %c0_i32_0 = arith.constant 0 : i32
    %c0_i32_1 = arith.constant 0 : i32
    return %c0_i32, %c0_i32_0 : i32, i32
  }
  func.func @transform_3(%arg0: i32) -> (i32, i32) {
    %c0_i32 = arith.constant 0 : i32
    %c0_i32_0 = arith.constant 0 : i32
    %c0_i32_1 = arith.constant 0 : i32
    return %c0_i32, %c0_i32_0 : i32, i32
  }
  func.func @transform_4(%arg0: i32) -> (i32, i32) {
    %c0_i32 = arith.constant 0 : i32
    %c0_i32_0 = arith.constant 0 : i32
    %c0_i32_1 = arith.constant 0 : i32
    return %c0_i32, %c0_i32_0 : i32, i32
  }
  func.func @transform_5(%arg0: i32) -> (i32, i32) {
    %c0_i32 = arith.constant 0 : i32
    %c0_i32_0 = arith.constant 0 : i32
    return %arg0, %c0_i32 : i32, i32
  }
}

</mosaic_0001>

<bundles_post_ra>
// kernel: tpu_custom_call.1
= control target key start
LH: loop header
LB: loop body
LE: loop exit
PB: predicated region body
PF: predicated region fallthrough
CT: control target
= control target key end

     0   :  { %v478_v1 = vmov 0.0   ;;  %vm479_vm0 = vmmov 0   ;;  %s568_s0 = inlined_call_operand.vmem [shape: bf16[2,8,32], index: 0, kind: input, shape index: {}]   ;;  %s569_s1 = inlined_call_operand.vmem [shape: bf16[32,64], index: 1, kind: input, shape index: {}]   ;;  %s570_s2 = inlined_call_operand.vmem [shape: f32[1,64], index: 2, kind: input, shape index: {}]   ;;  %s571_s3 = inlined_call_operand.vmem [shape: f32[32,1], index: 3, kind: input, shape index: {}]   ;;  %s572_s4 = inlined_call_operand.vmem [shape: f32[1,32], index: 4, kind: input, shape index: {}]   ;;  %s573_s5 = inlined_call_operand.hbm [shape: f32[2,64], index: 5, kind: output, shape index: {}]  }
   0x1   :  { %v441_v0 = vld [vmem:[%s569_s1 + $0x8] sm:$0xff]   ;;  %412 = vmatprep.subr.bf16.mxu0 %v478_v1  ;;  %v442_v2 = vld [vmem:[%s569_s1] sm:$0xff]   ;;  %416 = vmatprep.mubr.msk.bf16.mxu0 %vm479_vm0, %v478_v1 }
   0x2   :  { %413 = vmatpush3.bf16.msra.mxu0 %v441_v0 }
   0x3   :  { %414 = vmatprep.subr.bf16.mxu0 %v478_v1 }
   0x4   :  { %10 = vsyncpa [#allocation3], 0  ;;  %v443_v3 = vld [vmem:[%s568_s0] sm:$0xff]   ;;  %vm52_vm1 = vcmask 261120   ;;  %v100_v4 = vld [vmem:[%s571_s3 + $0x18] sm:$0xff]  ;;  %s480_s7 = smov 96  }
   0x5   :  { %v99_v5 = vld [vmem:[%s571_s3 + $0x10] sm:$0xff]  ;;  %420 = vmatprep.subr.mxu1 %v100_v4  ;;  %v98_v6 = vld [vmem:[%s571_s3 + $0x8] sm:$0xff]  ;;  %v97_v7 = vld [vmem:[%s571_s3] sm:$0xff]  ;;  %vm232_vm2 = vcmask 1040384   ;;  %vm186_vm3 = vcmask 7168   ;;  %vm363_vm4 = vcmask 1041409  }
   0x6   :  { %415 = vmatpush3.bf16.msra.mxu0 %v442_v2  ;;  %421 = vmatpush3.msra.mxu1 %v100_v4  ;;  %v390_v8 = vld [vmem:[%s570_s2] ss:$0 sm:$0xff]  ;;  %vm366_vm5 = vcmask 254976   ;;  %s482_s8 = smov [#allocation2]   ;;  %vm374_vm10 = vcmask 517376  }
   0x7   :  { %422 = vmatprep.subr.mxu1 %v99_v5  ;;  %v225_v17 = vld [vmem:[%s572_s4] sm:$0x1]  ;;  %s481_s4 = smov 32   ;;  %s382_s9 = sshll.u32 %s482_s8, 4  ;;  %s383_s9 = int_to_ptr.vmem [resolvable:$true] %s382_s9 }
   0x8   :  { %423 = vmatpush3.msra.mxu1 %v99_v5  ;;  %s456_s10 = scalar_lea.vmem %s383_s9, 32  ;;  %p461_p1 = scmp.lt.s32.totalorder %s383_s9, %s383_s9 }
   0x9   :  { %417 = vmatmul.mubr.msk.bf16.vlgmr.msra.gmra.mxu0 %vm52_vm1, %v443_v3  ;;  %424 = vmatprep.subr.mxu1 %v98_v6  ;;  %p457_p0 = scmp.ne.s32.totalorder %s383_s9, %s456_s10  ;;  %p462_p2 = scmp.lt.s32.totalorder %s456_s10, %s456_s10 }
   0xa   :  { %425 = vmatpush3.msra.mxu1 %v98_v6 }
   0xb   :  { %426 = vmatprep.subr.mxu1 %v97_v7  ;;  %p463_p3 = por %p462_p2, %p461_p1 }
   0xc   :  { %427 = vmatpush3.msra.mxu1 %v97_v7 }
   0xd   :  { %431 = vmatprep.subr.msk.mxu1 %vm232_vm2, %v225_v17  ;;  %p464_p4 = pnand %p463_p3, %p457_p0 }
  0xc9   :  { %v90_v9 = vpop.f32.mrf.mxu0 }
  0xca   :  { %v538_v10 = vadd.f32 %v390_v8, %v90_v9 }
  0xcb   :  { %v418_v11 = vpop.f32.mrf.mxu0 }
  0xcc   :  { %103 = vrot.lane.b32.xlu0 %v538_v10, %s480_s7 }
  0xcd   :  { %v93_v12 = vpop.f32.mrf.mxu0 }
  0xce   :  { %v541_v13 = vadd.f32 %v390_v8, %v93_v12 }
  0xcf   :  { %v419_v14 = vpop.f32.mrf.mxu0 }
  0xd0   :  { %105 = vrot.lane.b32.xlu0 %v541_v13, %s480_s7 }
 0x13e   :  { %v104_v15 = vpop.permute.xlu0 %103 }
 0x13f   :  { %428 = vmatprep.mubr.msk.f32.mxu1 %vm52_vm1, %v104_v15 }
 0x142   :  { %v106_v16 = vpop.permute.xlu0 %105 }
 0x143   :  { %429 = vmatmul.mubr.msk.f32.vlgmr.msra.gmra.mxu1 %vm52_vm1, %v106_v16 }
 0x144   :  { %432 = vmatpush3.msk.msra.mxu1 %vm232_vm2, %v225_v17 }
 0x203   :  { %v430_v18 = vpop.f32.mrf.mxu1 }
 0x204   :  { %v194_v19 = vsel %vm186_vm3, %v430_v18, -inf }
 0x205   :  { %v195_v20 = vrot.slane %v194_v19, 4  ;;  %v177_v21 = vpop.f32.mrf.mxu1 }
 0x206   :  { %v187_v22 = vsel %vm186_vm3, %v177_v21, -inf }
 0x207   :  { %v196_v23 = vmax.f32 %v194_v19, %v195_v20  ;;  %v188_v24 = vrot.slane %v187_v22, 4 }
 0x209   :  { %v197_v25 = vrot.slane %v196_v23, 2  ;;  %v189_v26 = vmax.f32 %v187_v22, %v188_v24 }
 0x20b   :  { %v198_v27 = vmax.f32 %v196_v23, %v197_v25  ;;  %v190_v28 = vrot.slane %v189_v26, 2 }
 0x20d   :  { %v199_v29 = vrot.slane %v198_v27, 1  ;;  %v191_v30 = vmax.f32 %v189_v26, %v190_v28 }
 0x20f   :  { %v200_v31 = vmax.f32 %v198_v27, %v199_v29  ;;  %v192_v32 = vrot.slane %v191_v30, 1 }
 0x211   :  { %v202_v33 = vsub.f32 %v430_v18, %v200_v31  ;;  %v193_v34 = vmax.f32 %v191_v30, %v192_v32 }
 0x213   :  { %v205_v35 = vmul.f32 1.442695, %v202_v33  ;;  %v201_v36 = vsub.f32 %v177_v21, %v193_v34 }
 0x215   :  { %444 = vpow2.f32 %v205_v35  ;;  %v203_v37 = vmul.f32 1.442695, %v201_v36 }
 0x217   :  { %446 = vpow2.f32 %v203_v37 }
 0x222   :  { %v445_v38 = vpop.eup %444 }
 0x223   :  { %v214_v39 = vsel %vm186_vm3, %v445_v38, 0.0 }
 0x224   :  { %v447_v40 = vpop.eup %446  ;;  %v215_v41 = vrot.slane %v214_v39, 4 }
 0x225   :  { %v207_v42 = vsel %vm186_vm3, %v447_v40, 0.0 }
 0x226   :  { %v216_v43 = vadd.f32 %v215_v41, %v214_v39  ;;  %v208_v44 = vrot.slane %v207_v42, 4 }
 0x228   :  { %v217_v45 = vrot.slane %v216_v43, 2  ;;  %v209_v46 = vadd.f32 %v208_v44, %v207_v42 }
 0x22a   :  { %v218_v47 = vadd.f32 %v217_v45, %v216_v43  ;;  %v210_v48 = vrot.slane %v209_v46, 2 }
 0x22c   :  { %v219_v49 = vrot.slane %v218_v47, 1  ;;  %v211_v50 = vadd.f32 %v210_v48, %v209_v46 }
 0x22e   :  { %v220_v51 = vadd.f32 %v219_v49, %v218_v47  ;;  %v212_v52 = vrot.slane %v211_v50, 1 }
 0x230   :  { %v213_v53 = vadd.f32 %v212_v52, %v211_v50  ;;  %448 = vrcp.f32 %v220_v51 }
 0x232   :  { %450 = vrcp.f32 %v213_v53 }
 0x23d   :  { %v449_v54 = vpop.eup %448 }
 0x23e   :  { %v224_v57 = vmul.f32 %v449_v54, %v445_v38 }
 0x23f   :  { %v451_v55 = vpop.eup %450 }
 0x240   :  { %v223_v56 = vmul.f32 %v451_v55, %v447_v40 }
 0x242   :  { %433 = vmatprep.mubr.msk.f32.mxu1 %vm186_vm3, %v223_v56 }
 0x243   :  { %434 = vmatmul.mubr.msk.f32.vlgmr.msra.gmra.mxu1 %vm186_vm3, %v224_v57 }
 0x303   :  { %v435_v58 = vpop.f32.mrf.mxu1 }
 0x304   :  { %v312_v59 = vmul.f32 %v435_v58, %v541_v13 }
 0x305   :  { %v302_v60 = vpop.f32.mrf.mxu1 }
 0x306   :  { %v320_v61 = vsel %vm52_vm1, %v312_v59, 0.0  ;;  %v311_v62 = vmul.f32 %v302_v60, %v538_v10 }
 0x307   :  { %v321_v63 = vrot.slane %v320_v61, 4 }
 0x308   :  { %v313_v0 = vsel %vm52_vm1, %v311_v62, 0.0 }
 0x309   :  { %v322_v1 = vadd.f32 %v321_v63, %v320_v61  ;;  %v314_v2 = vrot.slane %v313_v0, 4 }
 0x30b   :  { %v323_v3 = vrot.slane %v322_v1, 2  ;;  %v315_v4 = vadd.f32 %v314_v2, %v313_v0 }
 0x30d   :  { %v324_v5 = vadd.f32 %v323_v3, %v322_v1  ;;  %v316_v6 = vrot.slane %v315_v4, 2 }
 0x30f   :  { %v325_v7 = vrot.slane %v324_v5, 1  ;;  %v317_v8 = vadd.f32 %v316_v6, %v315_v4 }
 0x311   :  { %v326_v9 = vadd.f32 %v325_v7, %v324_v5  ;;  %v318_v11 = vrot.slane %v317_v8, 1 }
 0x313   :  { %v328_v12 = vsub.f32 %v541_v13, %v326_v9  ;;  %v319_v14 = vadd.f32 %v318_v11, %v317_v8 }
 0x315   :  { %v330_v15 = vmul.f32 %v435_v58, %v328_v12  ;;  %v327_v16 = vsub.f32 %v538_v10, %v319_v14  ;;  %v364_v17 = vsel %vm363_vm4, %v326_v9, %v319_v14 }
 0x316   :  { %367 = vst.msk [vmem:[#allocation2] sm:$0x3] %vm366_vm5, %v364_v17 }
 0x317   :  { %v332_v18 = vmul.f32 %v330_v15, %v328_v12  ;;  %v329_v19 = vmul.f32 %v327_v16, %v302_v60 }
 0x319   :  { %v340_v20 = vsel %vm52_vm1, %v332_v18, 0.0  ;;  %v331_v21 = vmul.f32 %v329_v19, %v327_v16 }
 0x31a   :  { %v341_v22 = vrot.slane %v340_v20, 4 }
 0x31b   :  { %v333_v23 = vsel %vm52_vm1, %v331_v21, 0.0 }
 0x31c   :  { %v342_v24 = vadd.f32 %v341_v22, %v340_v20  ;;  %v334_v25 = vrot.slane %v333_v23, 4 }
 0x31e   :  { %v343_v26 = vrot.slane %v342_v24, 2  ;;  %v335_v13 = vadd.f32 %v334_v25, %v333_v23 }
 0x320   :  { %v344_v27 = vadd.f32 %v343_v26, %v342_v24  ;;  %v336_v28 = vrot.slane %v335_v13, 2 }
 0x322   :  { %v345_v29 = vrot.slane %v344_v27, 1  ;;  %v337_v30 = vadd.f32 %v336_v28, %v335_v13 }
 0x324   :  { %v346_v10 = vadd.f32 %v345_v29, %v344_v27  ;;  %v338_v31 = vrot.slane %v337_v30, 1 }
 0x326   :  { %v339_v32 = vadd.f32 %v338_v31, %v337_v30  ;;  %452 = vrsqrt.f32 %v346_v10  ;;  %vm356_vm6 = vcmp.eq.f32.partialorder %v346_v10, inf  ;;  %v359_v39 = vand.u32 2147483648, %v346_v10 }
 0x327   :  { %vm358_vm9 = vcmp.eq.f32.partialorder %v346_v10, 0.0 }
 0x328   :  { %454 = vrsqrt.f32 %v339_v32  ;;  %vm349_vm7 = vcmp.eq.f32.partialorder %v339_v32, inf  ;;  %v352_v38 = vand.u32 2147483648, %v339_v32  ;;  %vm351_vm8 = vcmp.eq.f32.partialorder %v339_v32, 0.0 }
 0x333   :  { %v453_v33 = vpop.eup %452 }
 0x334   :  { %v355_v34 = vmul.f32 %v453_v33, %v346_v10 }
 0x335   :  { %v455_v35 = vpop.eup %454 }
 0x336   :  { %v348_v36 = vmul.f32 %v455_v35, %v339_v32  ;;  %v357_v37 = vsel %vm356_vm6, %v346_v10, %v355_v34 }
 0x337   :  { %v360_v42 = vsel %vm358_vm9, %v359_v39, %v357_v37 }
 0x338   :  { %v350_v40 = vsel %vm349_vm7, %v339_v32, %v348_v36 }
 0x339   :  { %v353_v41 = vsel %vm351_vm8, %v352_v38, %v350_v40 }
 0x33a   :  { %v370_v43 = vsel %vm363_vm4, %v360_v42, %v353_v41 }
 0x33b   :  { %371 = vrot.lane.b32.xlu1 %v370_v43, %s481_s4 }
 0x3ad   :  { %v372_v44 = vpop.permute.xlu1 %371 }
 0x3ae   :  { %375 = vst.msk [vmem:[#allocation2] sm:$0x3] %vm374_vm10, %v372_v44 }
 0x3af   :  { %467 = shalt.err (!%p464_p4)
}
 0x3b0   :  { %385 = dma.vmem_to_hbm [thread:$0]  %s383_s9, 32, %s573_s5, [#allocation3]  }
 0x3b1   :  { %476 = dma.done.wait [#allocation3], 32  }
 0x3b2   :  { %477 = vsyncadd [#allocation3], 4294967264 }
 0x3b3   :  { %389 = vsyncpa [#allocation3], 1 }

</bundles_post_ra>
